<compile_context>
chip_gen: v6e
topology: v6e:2x2x1
jax: 0.10.0
libtpu: 0.0.40
codegen_flags: <defaults>
</compile_context>

<pallas_src>
import jax
import jax.numpy as jnp
from jax.experimental import pallas as pl
from jax.experimental.pallas import tpu as pltpu


def adain_kernel(x_ref, noise_ref, bparam_ref, scale_ref, shift_ref, o_ref):
    # x_ref:      (1, TC, HW)  channel tile of one batch element
    # noise_ref:  (1, 1, HW)   per-batch noise (resident across channel tiles)
    # bparam_ref: (C, 1)       learned per-channel noise weight (resident)
    # scale_ref:  (1, C, 1)    style[:, 0] for this batch (resident per batch)
    # shift_ref:  (1, C, 1)    style[:, 1] for this batch (resident per batch)
    # o_ref:      (1, TC, HW)
    tc = x_ref.shape[1]
    hw = x_ref.shape[2]
    ch = pl.multiple_of(pl.program_id(1) * tc, tc)

    x = x_ref[0].astype(jnp.float32)                             # (TC, HW)
    noise = noise_ref[0].astype(jnp.float32)                     # (1, HW)
    bp = bparam_ref[pl.ds(ch, tc), :].astype(jnp.float32)        # (TC, 1)
    scale = scale_ref[0, pl.ds(ch, tc), :].astype(jnp.float32)   # (TC, 1)
    shift = shift_ref[0, pl.ds(ch, tc), :].astype(jnp.float32)   # (TC, 1)

    # x = x + B.view(1, C, 1, 1) * noise
    xp = x + bp * noise

    # PixelNorm over spatial dims: fused single-pass moments so both
    # reductions issue concurrently (no mean -> center -> var serial chain).
    inv_hw = 1.0 / float(hw)
    s1 = jnp.sum(xp, axis=-1, keepdims=True)                     # (TC, 1)
    s2 = jnp.sum(xp * xp, axis=-1, keepdims=True)                # (TC, 1)
    mean = s1 * inv_hw
    var = s2 * inv_hw - mean * mean
    inv = jax.lax.rsqrt(var + 1e-8)

    # Fold PixelNorm + style affine into one per-channel scale/bias:
    # out = (xp - mean) * inv * (scale + 1) + shift  ==  xp * g + b
    g = inv * (scale + 1.0)                                      # (TC, 1)
    b = shift - mean * g                                         # (TC, 1)
    o_ref[0] = (xp * g + b).astype(o_ref.dtype)


def _choose_channel_tile(C, HW, itemsize, target_bytes=2 * 1024 * 1024):
    """Largest multiple-of-8 divisor of C whose (TC, HW) tile fits the budget."""
    if C % 8 != 0:
        # Full-C block is always legal (block dim equals the full array dim).
        return C
    candidates = [tc for tc in range(8, C + 1, 8) if C % tc == 0]
    fitting = [tc for tc in candidates if tc * HW * itemsize <= target_bytes]
    return max(fitting) if fitting else min(candidates)


def adain_forward(x, w, A_weight, A_bias, B_param, noise,
                  *, target_tile_bytes=2 * 1024 * 1024):
    """x: (B, C, H, W), w: (B, latent), A_weight: (2C, latent), A_bias: (2C,),
    B_param: (C,), noise: (B, 1, H, W). Returns (B, C, H, W)."""
    Bn, C, H, W = x.shape
    HW = H * W

    # Glue: tiny linear producing the style vector (B, 2C) stays in XLA.
    style = jnp.dot(w, A_weight.T) + A_bias                 # (B, 2C)
    scale = style[:, :C].reshape(Bn, C, 1)                  # style[:, 0]
    shift = style[:, C:].reshape(Bn, C, 1)                  # style[:, 1]

    x2 = x.reshape(Bn, C, HW)
    noise2 = noise.reshape(Bn, 1, HW)
    bparam = B_param.reshape(C, 1)

    TC = _choose_channel_tile(C, HW, x.dtype.itemsize, target_tile_bytes)
    n_cblocks = C // TC

    # TODO(synk): for StyleGAN stages where H*W is not a multiple of 128
    # (e.g. 4x4, 8x8), the output last dim forces masked partial stores;
    # a lane-padding + masked-reduction variant would recover full vst width.
    out = pl.pallas_call(
        adain_kernel,
        out_shape=jax.ShapeDtypeStruct((Bn, C, HW), x.dtype),
        grid_spec=pltpu.PrefetchScalarGridSpec(
            num_scalar_prefetch=0,
            grid=(Bn, n_cblocks),          # batch outer, channel tile inner
            in_specs=[
                pl.BlockSpec((1, TC, HW), lambda b, c: (b, c, 0)),   # x tile
                pl.BlockSpec((1, 1, HW), lambda b, c: (b, 0, 0)),    # noise: per-batch, no re-DMA across c
                pl.BlockSpec((C, 1), lambda b, c: (0, 0)),           # B param: resident
                pl.BlockSpec((1, C, 1), lambda b, c: (b, 0, 0)),     # scale: resident per batch
                pl.BlockSpec((1, C, 1), lambda b, c: (b, 0, 0)),     # shift: resident per batch
            ],
            out_specs=pl.BlockSpec((1, TC, HW), lambda b, c: (b, c, 0)),
        ),
        compiler_params=pltpu.CompilerParams(
            dimension_semantics=("parallel", "parallel"),
            vmem_limit_bytes=32 * 1024 * 1024,
        ),
    )(x2, noise2, bparam, scale, shift)

    return out.reshape(Bn, C, H, W)


if __name__ == "__main__":
    key = jax.random.PRNGKey(0)
    k_x, k_w, k_A, k_noise = jax.random.split(key, 4)

    batch, channels, H, W = 2, 4, 16, 16
    latent = 8

    x = jax.random.normal(k_x, (batch, channels, H, W), dtype=jnp.float32)
    w = jax.random.normal(k_w, (batch, latent), dtype=jnp.float32)

    # Parameters (deterministic init mirroring the PyTorch __init__):
    #   A: Linear(latent, 2*channels), xavier_normal_ weight, zero bias.
    #   B: zeros(channels).
    fan_in, fan_out = latent, 2 * channels
    xavier_std = (2.0 / (fan_in + fan_out)) ** 0.5
    A_weight = xavier_std * jax.random.normal(
        k_A, (2 * channels, latent), dtype=jnp.float32)
    A_bias = jnp.zeros((2 * channels,), dtype=jnp.float32)
    B_param = jnp.zeros((channels,), dtype=jnp.float32)

    # Noise is random in the PyTorch module; generated here deterministically
    # and passed in so the kernel semantics are reproducible.
    noise = jax.random.normal(k_noise, (batch, 1, H, W), dtype=jnp.float32)

    out = adain_forward(x, w, A_weight, A_bias, B_param, noise)
    jax.block_until_ready(out)

    # Pure-JAX reference check of the same semantics.
    def ref(x, w, A_weight, A_bias, B_param, noise):
        xn = x + B_param.reshape(1, -1, 1, 1) * noise
        m = jnp.mean(xn, axis=(2, 3), keepdims=True)
        xc = xn - m
        inv = jax.lax.rsqrt(jnp.mean(xc * xc, axis=(2, 3), keepdims=True) + 1e-8)
        xp = xc * inv
        style = (jnp.dot(w, A_weight.T) + A_bias).reshape(
            -1, 2, x.shape[1], 1, 1)
        return xp * (style[:, 0] + 1.0) + style[:, 1]

    expected = ref(x, w, A_weight, A_bias, B_param, noise)
    assert jnp.allclose(out, expected, atol=1e-5, rtol=1e-5), "mismatch vs reference"
    print("KERNEL_OK")
</pallas_src>

<mosaic_0001>
module attributes {stable_mosaic.version = 11 : i64} {
  func.func @adain_kernel(%arg0: i32, %arg1: i32, %arg2: memref<1x4x256xf32, #tpu.memory_space<vmem>>, %arg3: memref<1x1x256xf32, #tpu.memory_space<vmem>>, %arg4: memref<4x1xf32, #tpu.memory_space<vmem>>, %arg5: memref<1x4x1xf32, #tpu.memory_space<vmem>>, %arg6: memref<1x4x1xf32, #tpu.memory_space<vmem>>, %arg7: memref<1x4x256xf32, #tpu.memory_space<vmem>>) attributes {dimension_semantics = [#tpu.dimension_semantics<parallel>, #tpu.dimension_semantics<parallel>], iteration_bounds = array<i64: 2, 1>, scalar_prefetch = 0 : i64, scratch_operands = 0 : i64, tpu.core_type = #tpu.core_type<tc>, window_params = [{transform_indices = @transform_0, window_bounds = array<i64: 1, 4, 256>}, {transform_indices = @transform_1, window_bounds = array<i64: 1, 1, 256>}, {pipeline_mode = #tpu.pipeline_mode<synchronous>, transform_indices = @transform_2, window_bounds = array<i64: 4, 1>}, {transform_indices = @transform_3, window_bounds = array<i64: 1, 4, 1>}, {transform_indices = @transform_4, window_bounds = array<i64: 1, 4, 1>}, {transform_indices = @transform_5, window_bounds = array<i64: 1, 4, 256>}]} {
    %c4_i32 = arith.constant 4 : i32
    %0 = arith.muli %arg1, %c4_i32 : i32
    %1 = tpu.assume_multiple %0, 4 : i32
    %c0 = arith.constant 0 : index
    %c0_0 = arith.constant 0 : index
    %c0_1 = arith.constant 0 : index
    %2 = vector.load %arg2[%c0, %c0_0, %c0_1] : memref<1x4x256xf32, #tpu.memory_space<vmem>>, vector<1x4x256xf32>
    %3 = vector.shape_cast %2 : vector<1x4x256xf32> to vector<4x256xf32>
    %c0_2 = arith.constant 0 : index
    %c0_3 = arith.constant 0 : index
    %c0_4 = arith.constant 0 : index
    %4 = vector.load %arg3[%c0_2, %c0_3, %c0_4] : memref<1x1x256xf32, #tpu.memory_space<vmem>>, vector<1x1x256xf32>
    %5 = vector.shape_cast %4 : vector<1x1x256xf32> to vector<1x256xf32>
    %6 = arith.index_cast %1 : i32 to index
    %c0_5 = arith.constant 0 : index
    %7 = vector.load %arg4[%6, %c0_5] : memref<4x1xf32, #tpu.memory_space<vmem>>, vector<4x1xf32>
    %c0_6 = arith.constant 0 : index
    %8 = arith.index_cast %1 : i32 to index
    %c0_7 = arith.constant 0 : index
    %9 = vector.load %arg5[%c0_6, %8, %c0_7] : memref<1x4x1xf32, #tpu.memory_space<vmem>>, vector<1x4x1xf32>
    %10 = vector.shape_cast %9 : vector<1x4x1xf32> to vector<4x1xf32>
    %c0_8 = arith.constant 0 : index
    %11 = arith.index_cast %1 : i32 to index
    %c0_9 = arith.constant 0 : index
    %12 = vector.load %arg6[%c0_8, %11, %c0_9] : memref<1x4x1xf32, #tpu.memory_space<vmem>>, vector<1x4x1xf32>
    %13 = vector.shape_cast %12 : vector<1x4x1xf32> to vector<4x1xf32>
    %14 = vector.broadcast %7 : vector<4x1xf32> to vector<4x256xf32>
    %15 = vector.broadcast %5 : vector<1x256xf32> to vector<4x256xf32>
    %16 = arith.mulf %14, %15 : vector<4x256xf32>
    %17 = arith.addf %3, %16 : vector<4x256xf32>
    %cst = arith.constant dense<0.000000e+00> : vector<4xf32>
    %18 = vector.multi_reduction <add>, %17, %cst [1] : vector<4x256xf32> to vector<4xf32>
    %19 = vector.shape_cast %18 : vector<4xf32> to vector<4x1xf32>
    %20 = arith.mulf %17, %17 : vector<4x256xf32>
    %cst_10 = arith.constant dense<0.000000e+00> : vector<4xf32>
    %21 = vector.multi_reduction <add>, %20, %cst_10 [1] : vector<4x256xf32> to vector<4xf32>
    %22 = vector.shape_cast %21 : vector<4xf32> to vector<4x1xf32>
    %cst_11 = arith.constant 3.906250e-03 : f32
    %23 = vector.broadcast %cst_11 : f32 to vector<4x1xf32>
    %24 = arith.mulf %19, %23 : vector<4x1xf32>
    %cst_12 = arith.constant 3.906250e-03 : f32
    %25 = vector.broadcast %cst_12 : f32 to vector<4x1xf32>
    %26 = arith.mulf %22, %25 : vector<4x1xf32>
    %27 = arith.mulf %24, %24 : vector<4x1xf32>
    %28 = arith.subf %26, %27 : vector<4x1xf32>
    %cst_13 = arith.constant 9.99999993E-9 : f32
    %29 = vector.broadcast %cst_13 : f32 to vector<4x1xf32>
    %30 = arith.addf %28, %29 : vector<4x1xf32>
    %31 = math.rsqrt %30 : vector<4x1xf32>
    %cst_14 = arith.constant 1.000000e+00 : f32
    %32 = vector.broadcast %cst_14 : f32 to vector<4x1xf32>
    %33 = arith.addf %10, %32 : vector<4x1xf32>
    %34 = arith.mulf %31, %33 : vector<4x1xf32>
    %35 = arith.mulf %24, %34 : vector<4x1xf32>
    %36 = arith.subf %13, %35 : vector<4x1xf32>
    %37 = vector.broadcast %34 : vector<4x1xf32> to vector<4x256xf32>
    %38 = arith.mulf %17, %37 : vector<4x256xf32>
    %39 = vector.broadcast %36 : vector<4x1xf32> to vector<4x256xf32>
    %40 = arith.addf %38, %39 : vector<4x256xf32>
    %c0_15 = arith.constant 0 : index
    %c0_16 = arith.constant 0 : index
    %c0_17 = arith.constant 0 : index
    %41 = vector.load %arg7[%c0_15, %c0_16, %c0_17] : memref<1x4x256xf32, #tpu.memory_space<vmem>>, vector<1x4x256xf32>
    %42 = vector.shape_cast %41 : vector<1x4x256xf32> to vector<4x256xf32>
    %43 = vector.shape_cast %40 : vector<4x256xf32> to vector<1x4x256xf32>
    tpu.vector_store %arg7[%c0_15, %c0_16, %c0_17], %43 {strides = array<i32>} : memref<1x4x256xf32, #tpu.memory_space<vmem>>, vector<1x4x256xf32>,
    return
  }
  func.func @transform_0(%arg0: i32, %arg1: i32) -> (i32, i32, i32) {
    %c0_i32 = arith.constant 0 : i32
    %c0_i32_0 = arith.constant 0 : i32
    return %arg0, %arg1, %c0_i32 : i32, i32, i32
  }
  func.func @transform_1(%arg0: i32, %arg1: i32) -> (i32, i32, i32) {
    %c0_i32 = arith.constant 0 : i32
    %c0_i32_0 = arith.constant 0 : i32
    %c0_i32_1 = arith.constant 0 : i32
    return %arg0, %c0_i32, %c0_i32_0 : i32, i32, i32
  }
  func.func @transform_2(%arg0: i32, %arg1: i32) -> (i32, i32) {
    %c0_i32 = arith.constant 0 : i32
    %c0_i32_0 = arith.constant 0 : i32
    %c0_i32_1 = arith.constant 0 : i32
    return %c0_i32, %c0_i32_0 : i32, i32
  }
  func.func @transform_3(%arg0: i32, %arg1: i32) -> (i32, i32, i32) {
    %c0_i32 = arith.constant 0 : i32
    %c0_i32_0 = arith.constant 0 : i32
    %c0_i32_1 = arith.constant 0 : i32
    return %arg0, %c0_i32, %c0_i32_0 : i32, i32, i32
  }
  func.func @transform_4(%arg0: i32, %arg1: i32) -> (i32, i32, i32) {
    %c0_i32 = arith.constant 0 : i32
    %c0_i32_0 = arith.constant 0 : i32
    %c0_i32_1 = arith.constant 0 : i32
    return %arg0, %c0_i32, %c0_i32_0 : i32, i32, i32
  }
  func.func @transform_5(%arg0: i32, %arg1: i32) -> (i32, i32, i32) {
    %c0_i32 = arith.constant 0 : i32
    %c0_i32_0 = arith.constant 0 : i32
    return %arg0, %arg1, %c0_i32 : i32, i32, i32
  }
}

</mosaic_0001>

<bundles_post_ra>
// kernel: tpu_custom_call.1
= control target key start
LH: loop header
LB: loop body
LE: loop exit
PB: predicated region body
PF: predicated region fallthrough
CT: control target
= control target key end

     0   :  { %10 = vsyncpa [#allocation3], 0  ;;  %s833_s0 = inlined_call_operand.vmem [shape: f32[2,4,256], index: 0, kind: input, shape index: {}]   ;;  %s834_s1 = inlined_call_operand.vmem [shape: f32[2,1,256], index: 1, kind: input, shape index: {}]   ;;  %s835_s2 = inlined_call_operand.vmem [shape: f32[4,1], index: 2, kind: input, shape index: {}]   ;;  %s836_s3 = inlined_call_operand.vmem [shape: f32[2,4,1], index: 3, kind: input, shape index: {}]   ;;  %s837_s4 = inlined_call_operand.vmem [shape: f32[2,4,1], index: 4, kind: input, shape index: {}]   ;;  %s838_s5 = inlined_call_operand.hbm [shape: f32[2,4,256], index: 5, kind: output, shape index: {}]  }
   0x1   :  { %12 = vsyncpa [#allocation3 + $0x1], 0  ;;  %s717_s18 = smov 0   ;;  %s719_s19 = smov 0  }
   0x2   :  { %s721_s20 = smov 0   ;;  %s723_s21 = smov 0  }
   0x3   :  { %s725_s22 = smov 0   ;;  %s727_s23 = smov 0  }
   0x4 LB: > { %s527_s24 = sadd.s32 4294967295, %s682_s23   ;;  %s528_s25 = sadd.s32 4294967294, %s682_s23   ;;  %s682_s23 = sphi %s727_s23, %s18_s23   ;;  %s678_s22 = sphi %s725_s22, %s845_s22   ;;  %s674_s21 = sphi %s723_s21, %s844_s21   ;;  %s670_s20 = sphi %s721_s20, %s843_s20   ;;  %s666_s19 = sphi %s719_s19, %s842_s19   ;;  %s662_s18 = sphi %s717_s18, %s841_s18  }
   0x5   : > { %s30_s26 = sadd.s32 1, %s678_s22  ;;  %s166_s27 = sadd.s32 1, %s670_s20 }
   0x6   : > { %p32_p0 = scmp.ge.s32.totalorder %s30_s26, 2  ;;  %p176_p1 = scmp.ne.s32.totalorder %s670_s20, %s666_s19 }
   0x7   : > { %p177_p2 = scmp.eq.s32.totalorder %s527_s24, 1  ;;  %p182_p3 = scmp.ne.s32.totalorder %s666_s19, %s662_s18 }
   0x8   : > { %s847_s26 = smov (%p32_p0, %s30_s26), 0  ;;  %p183_p5 = scmp.eq.s32.totalorder %s528_s25, 1 }
   0x9   : > { %p757_p4 = por %p177_p2, %p176_p1  ;;  %s161_s29 = ssub.s32 %s678_s22, %s847_s26 }
   0xa   : > { %p531_p6 = scmp.ge.s32.totalorder %s682_s23, 1  ;;  %p164_p7 = scmp.eq.s32.totalorder %s161_s29, 0 }
   0xb   : > { %p764_p8 = por %p183_p5, %p182_p3  ;;  %p237_p9 = scmp.lt.s32.totalorder %s682_s23, 3 }
   0xc   : > { %s770_s6 = scalar_select %p164_p7, %s670_s20, %s166_s27  }
   0xd   : > { %p238_p10 = pnand %p531_p6, %p237_p9 }
   0xe   : > { %p281_p11 = scmp.lt.s32.totalorder (!%p238_p10), %s674_s21, 1  ;;  %s544_s12 = sshll.u32 (!%p238_p10), %s674_s21, 7 }
   0xf   : > { %241 = sbr.rel (%p238_p10) target bundleno = 464 (0x1d0), region = 40  ;;  %s686_s27 = smov (!%p238_p10), [#allocation2]  }
  0x14   : > { %v306_v0 = vld [vmem:[%s835_s2] sm:$0xf]  ;;  %v684_v1 = vmov 0   ;;  %s777_s9 = scalar_select %p281_p11, %s674_s21, 1  ;;  %v317_v2 = vlaneseq  ;;  %vm337_vm0 = vcmask 1043456  }
  0x15   : > { %602 = vset.pattern.permute.xlu0 %v684_v1  ;;  %603 = vset.pattern.permute.xlu1 %v684_v1  ;;  %v685_v38 = vmov 839922192  }
  0x16   : > { %313 = vperm.xlu0 %602, %v306_v0   ;;  %s535_s10 = sshll.u32 %s777_s9, 1  ;;  %v318_v3 = vshrl.u32 %v317_v2, 7  ;;  %s543_s14 = sshll.u32 %s777_s9, 3  ;;  %v367_v39 = vunpack.c.l.s4 %v685_v38 }
  0x17   : > { %s293_s13 = scalar_lea.vmem %s834_s1, %s535_s10  ;;  %s289_s17 = scalar_lea.vmem %s833_s0, %s543_s14 }
  0x18   : > { %v319_v4 = vsub.s32 0, %v318_v3  ;;  %v323_v5 = vsub.s32 1, %v318_v3  ;;  %v304_v6 = vld [vmem:[%s293_s13] sm:$0x3]  ;;  %s536_s24 = sshll.u32 %s777_s9, 2  ;;  %v368_v40 = vunpack.c.0.s8 %v367_v39  ;;  %s278_s9 = sand.u32 1, %s666_s19  }
  0x19   : > { %v303_v12 = vld [vmem:[%s289_s17] sm:$0xff]  ;;  %s297_s29 = scalar_lea.vmem %s836_s3, %s536_s24  ;;  %s301_s10 = scalar_lea.vmem %s837_s4, %s536_s24 }
  0x1a   : > { %v320_v7 = vrot.slane %v304_v6, %v319_v4  ;;  %v324_v8 = vrot.slane %v304_v6, %v323_v5  ;;  %v308_v31 = vld [vmem:[%s297_s29] sm:$0xf]  ;;  %v371_v41 = vsub.s32 %v368_v40, %v318_v3  ;;  %s532_s11 = sshll.u32 %s278_s9, 3  ;;  %s404_s17 = scalar_lea.hbm %s838_s5, %s544_s12 }
  0x1b   : > { %v358_v32 = vadd.f32 1.0, %v308_v31  ;;  %v310_v35 = vld [vmem:[%s301_s10] sm:$0xf]  ;;  %s280_s13 = scalar_lea.vmem [#allocation2], %s532_s11  ;;  %s390_s24 = scalar_lea.sflag [#allocation3], %s278_s9 }
  0x1c   : > { %s406_s14 = sshll.u32 %s280_s13, 4  ;;  %s610_s29 = sshll.u32 %s686_s27, 4  ;;  %s407_s14 = int_to_ptr.vmem [resolvable:$true] %s406_s14  ;;  %s611_s29 = int_to_ptr.vmem [resolvable:$false] %s610_s29 }
  0x1d   : > { %s606_s25 = scalar_lea.vmem %s407_s14, 128  ;;  %s612_s21 = scalar_lea.vmem %s611_s29, 256 }
  0x1e   : > { %p607_p12 = scmp.ne.s32.totalorder %s407_s14, %s606_s25  ;;  %p613_p1 = scmp.lt.s32.totalorder %s407_s14, %s611_s29 }
  0x1f   : > { %p614_p2 = scmp.lt.s32.totalorder %s612_s21, %s606_s25 }
  0x20   : > { %p608_p13 = pnand %p607_p12, %p757_p4 }
  0x21   : > { %p615_p3 = por %p614_p2, %p613_p1 }
  0x22   : > { %p609_p0 = pneg %p608_p13 }
  0x24   : > { %p616_p5 = pnand %p615_p3, %p609_p0 }
  0x91   : > { %v314_v9 = vpop.permute.xlu0 %313 }
  0x92   : > { %v327_v10 = vmul.f32 %v320_v7, %v314_v9  ;;  %v328_v11 = vmul.f32 %v324_v8, %v314_v9 }
  0x94   : > { %v331_v13 = vcombine.low %v327_v10, %v328_v11 }
  0x96   : > { %v333_v14 = vadd.f32 %v331_v13, %v303_v12 }
  0x98   : > { %v335_v15 = vcombine.high %v333_v14, %v333_v14  ;;  %v343_v16 = vmul.f32 %v333_v14, %v333_v14  ;;  %v338_v17 = vsel %vm337_vm0, %v333_v14, 0.0 }
  0x9a   : > { %v339_v18 = vsel %vm337_vm0, %v335_v15, 0.0  ;;  %v345_v19 = vcombine.high %v343_v16, %v343_v16  ;;  %v347_v21 = vsel %vm337_vm0, %v343_v16, 0.0 }
  0x9b   : > { %v340_v20 = vadd.f32 %v339_v18, %v338_v17 }
  0x9c   : > { %v348_v22 = vsel %vm337_vm0, %v345_v19, 0.0 }
  0x9d   : > { %341 = vadd.xlane.f32.xlu0 %v340_v20  ;;  %v349_v23 = vadd.f32 %v348_v22, %v347_v21 }
  0x9f   : > { %350 = vadd.xlane.f32.xlu1 %v349_v23 }
 0x126   : > { %v342_v24 = vpop.xlane.xlu0 %341 }
 0x127   : > { %v352_v25 = vmul.f32 0.00390625, %v342_v24 }
 0x128   : > { %v351_v26 = vpop.xlane.xlu1 %350 }
 0x129   : > { %v354_v27 = vmul.f32 %v352_v25, %v352_v25  ;;  %v353_v28 = vmul.f32 0.00390625, %v351_v26 }
 0x12b   : > { %v355_v29 = vsub.f32 %v353_v28, %v354_v27 }
 0x12d   : > { %v356_v30 = vadd.f32 1e-08, %v355_v29 }
 0x12f   : > { %604 = vrsqrt.f32 %v356_v30 }
 0x13c   : > { %v605_v33 = vpop.eup %604 }
 0x13d   : > { %v359_v34 = vmul.f32 %v605_v33, %v358_v32 }
 0x13f   : > { %364 = vperm.xlu1 %603, %v359_v34   ;;  %v360_v36 = vmul.f32 %v359_v34, %v352_v25 }
 0x141   : > { %v361_v37 = vsub.f32 %v310_v35, %v360_v36 }
 0x143   : > { %377 = vperm.xlu1 %603, %v361_v37  }
 0x1ba   : > { %v365_v42 = vpop.permute.xlu1 %364 }
 0x1bb   : > { %v372_v43 = vrot.slane %v365_v42, %v371_v41 }
 0x1bd   : > { %v374_v45 = vmul.f32 %v372_v43, %v333_v14 }
 0x1be   : > { %v378_v44 = vpop.permute.xlu1 %377 }
 0x1bf   : > { %v385_v46 = vrot.slane %v378_v44, %v371_v41 }
 0x1c1   : > { %v387_v47 = vadd.f32 %v385_v46, %v374_v45 }
 0x1c3   : > { %388 = vst [vmem:[%s280_s13] sm:$0xff] %v387_v47 }
 0x1c4   : > { %619 = shalt.err (!%p616_p5)
}
 0x1c5   : > { %s620_s7 = scalar_lea.hbm %s404_s17, 128  ;;  %s624_s9 = scalar_lea.hbm %s838_s5, 256 }
 0x1c6   : > { %p621_p6 = scmp.ne.s32.totalorder %s404_s17, %s620_s7  ;;  %p625_p10 = scmp.lt.s32.totalorder %s404_s17, %s838_s5 }
 0x1c7   : > { %p626_p11 = scmp.lt.s32.totalorder %s624_s9, %s620_s7 }
 0x1c8   : > { %p622_p7 = pnand %p621_p6, %p757_p4 }
 0x1c9   : > { %p627_p12 = por %p626_p11, %p625_p10 }
 0x1ca   : > { %p623_p9 = pneg %p622_p7 }
 0x1cc   : > { %p628_p13 = pnand %p627_p12, %p623_p9 }
 0x1ce   : > { %631 = shalt.err (!%p628_p13)
}
 0x1cf   : > { %545 = dma.vmem_to_hbm [thread:$0]  (%p757_p4), %s407_s14, 128, %s404_s17, %s390_s24  }
 0x1d0 PF: > { %p551_p0 = scmp.ge.s32.totalorder %s682_s23, 2  ;;  %s418_s13 = sand.u32 1, %s662_s18  }
 0x1d1   : > { %s419_s15 = scalar_lea.sflag [#allocation3], %s418_s13 }
 0x1d2   : > { %p548_p1 = pnand %p551_p0, %p764_p8 }
 0x1d4   : > { %p549_p2 = pneg %p548_p1 }
 0x1d6   : > { %657 = dma.done.wait (%p549_p2), %s419_s15, 128  }
 0x1d7   : > { %659 = vsyncadd (%p549_p2), %s419_s15, 4294967168  ;;  %s18_s23 = sadd.s32 1, %s682_s23   ;;  %s841_s18 = smov %s666_s19 }
 0x1d8   : > { %p15_p3 = scmp.ge.s32.totalorder %s18_s23, 4   ;;  %s842_s19 = smov %s670_s20 }
 0x1d9   : > { %s843_s20 = smov %s770_s6  ;;  %s844_s21 = smov %s678_s22 }
 0x1da   : > { %s845_s22 = smov %s847_s26  ;;  %17 = sbr.rel (!%p15_p3) target bundleno = 4 (0x4), region = 87 }
 0x1df   :  { %424 = vsyncpa [#allocation3], 1 }
 0x1e0   :  { %426 = vsyncpa [#allocation3 + $0x1], 1 }

</bundles_post_ra>
